<compile_context>
chip_gen: v7x
topology: tpu7x:2x2x1
jax: 0.10.0
libtpu: 0.0.40
codegen_flags: <defaults>
</compile_context>

<pallas_src>
import jax
import jax.numpy as jnp
from jax.experimental import pallas as pl
from jax.experimental.pallas import tpu as pltpu


def mlp_kernel(x_ref, w1_ref, b1_ref, w2_ref, b2_ref, o_ref):
    # x tile: (TM, 3) f32 in VMEM; parameters are f32 scalars in SMEM.
    x = x_ref[...]
    cols = [x[:, k:k + 1] for k in range(3)]          # three (TM, 1) columns
    acc = jnp.zeros((x.shape[0], 1), dtype=jnp.float32)
    for j in range(4):                                 # hidden units (H = 4)
        hj = cols[0] * w1_ref[3 * j + 0]               # fc1 row j, unrolled K = 3
        hj = hj + cols[1] * w1_ref[3 * j + 1]
        hj = hj + cols[2] * w1_ref[3 * j + 2]
        hj = hj + b1_ref[j]
        acc = acc + jnp.maximum(hj, 0.0) * w2_ref[j]   # ReLU + fc2 (N = 1)
    o_ref[...] = acc + b2_ref[0]


def prepare_params(w1, b1, w2, b2):
    """One-time parameter prep (hoisted out of the per-call path)."""
    return (
        jnp.asarray(w1, jnp.float32).reshape(-1),   # (12,) row-major fc1 weight
        jnp.asarray(b1, jnp.float32).reshape(-1),   # (4,)
        jnp.asarray(w2, jnp.float32).reshape(-1),   # (4,)
        jnp.asarray(b2, jnp.float32).reshape(-1),   # (1,)
    )


def _pick_batch_tile(B):
    # Largest nice batch tile that divides B; fall back to one full block.
    for cand in (1024, 512, 256, 128, 64, 32, 16, 8):
        if B % cand == 0:
            return cand
    return B


@jax.jit
def model_forward(x, w1_flat, b1, w2_flat, b2):
    """x: (B, 3) float32 -> (B, 1) float32, same math as the PyTorch Model."""
    B = x.shape[0]
    tm = _pick_batch_tile(B)
    smem = pl.BlockSpec(memory_space=pltpu.MemorySpace.SMEM)
    return pl.pallas_call(
        mlp_kernel,
        out_shape=jax.ShapeDtypeStruct((B, 1), jnp.float32),
        grid=(B // tm,),
        in_specs=[
            pl.BlockSpec((tm, 3), lambda i: (i, 0)),   # batch tile of x
            smem,                                      # w1 (12,)
            smem,                                      # b1 (4,)
            smem,                                      # w2 (4,)
            smem,                                      # b2 (1,)
        ],
        out_specs=pl.BlockSpec((tm, 1), lambda i: (i, 0)),
        compiler_params=pltpu.CompilerParams(
            dimension_semantics=("parallel",)),
    )(x, w1_flat, b1, w2_flat, b2)


if __name__ == "__main__":
    # Deterministic parameters (same values the PyTorch module hardcodes).
    w1 = jnp.array(
        [[1.0, 2.0, 3.0],
         [-4.0, -5.0, -6.0],
         [7.0, 8.0, 9.0],
         [-10.0, -11.0, -12.0]], dtype=jnp.float32)
    b1 = jnp.array([1.0, 2.0, 3.0, 4.0], dtype=jnp.float32)
    w2 = jnp.array([[1.0, 2.0, 3.0, 4.0]], dtype=jnp.float32)
    b2 = jnp.array([1.0], dtype=jnp.float32)

    params = prepare_params(w1, b1, w2, b2)  # done once, not per forward call

    # Example input: the PyTorch script's [1,1,1] row plus random rows
    # (batch 16 -> grid of 2 tiles of 8, exercising the parallel grid axis).
    key = jax.random.PRNGKey(0)
    x_fixed = jnp.array([[1.0, 1.0, 1.0]], dtype=jnp.float32)
    x_rand = jax.random.normal(key, (15, 3), dtype=jnp.float32)
    x = jnp.concatenate([x_fixed, x_rand], axis=0)  # (16, 3)

    out = model_forward(x, *params)
    jax.block_until_ready(out)

    # Reference check in plain JAX.
    ref = jnp.maximum(x @ w1.T + b1, 0.0) @ w2.T + b2
    assert out.shape == (16, 1)
    assert jnp.allclose(out, ref, atol=1e-3, rtol=1e-5), (out, ref)
    # Known value for x = [1,1,1]: relu([7,-13,27,-29]) -> [7,0,27,0] -> 89
    assert jnp.allclose(out[0, 0], 89.0, atol=1e-3)

    print("KERNEL_OK")
</pallas_src>

<mosaic_0001>
module attributes {stable_mosaic.version = 11 : i64} {
  func.func @mlp_kernel(%arg0: i32, %arg1: memref<16x3xf32, #tpu.memory_space<vmem>>, %arg2: memref<12xf32, #tpu.memory_space<smem>>, %arg3: memref<4xf32, #tpu.memory_space<smem>>, %arg4: memref<4xf32, #tpu.memory_space<smem>>, %arg5: memref<1xf32, #tpu.memory_space<smem>>, %arg6: memref<16x1xf32, #tpu.memory_space<vmem>>) attributes {dimension_semantics = [#tpu.dimension_semantics<parallel>], iteration_bounds = array<i64: 1>, scalar_prefetch = 0 : i64, scratch_operands = 0 : i64, tpu.core_type = #tpu.core_type<tc>, window_params = [{transform_indices = @transform_0, window_bounds = array<i64: 16, 3>}, {transform_indices = @transform_1, window_bounds = array<i64: 12>}, {transform_indices = @transform_2, window_bounds = array<i64: 4>}, {transform_indices = @transform_3, window_bounds = array<i64: 4>}, {transform_indices = @transform_4, window_bounds = array<i64: 1>}, {transform_indices = @transform_5, window_bounds = array<i64: 16, 1>}]} {
    %c0 = arith.constant 0 : index
    %c0_0 = arith.constant 0 : index
    %0 = vector.load %arg1[%c0, %c0_0] : memref<16x3xf32, #tpu.memory_space<vmem>>, vector<16x3xf32>
    %1 = vector.extract_strided_slice %0 {offsets = [0, 0], sizes = [16, 1], strides = [1, 1]} : vector<16x3xf32> to vector<16x1xf32>
    %2 = vector.extract_strided_slice %0 {offsets = [0, 1], sizes = [16, 1], strides = [1, 1]} : vector<16x3xf32> to vector<16x1xf32>
    %3 = vector.extract_strided_slice %0 {offsets = [0, 2], sizes = [16, 1], strides = [1, 1]} : vector<16x3xf32> to vector<16x1xf32>
    %cst = arith.constant 0.000000e+00 : f32
    %4 = vector.broadcast %cst : f32 to vector<16x1xf32>
    %c0_1 = arith.constant 0 : index
    %5 = memref.load %arg2[%c0_1] : memref<12xf32, #tpu.memory_space<smem>>
    %6 = vector.broadcast %5 : f32 to vector<16x1xf32>
    %7 = arith.mulf %1, %6 : vector<16x1xf32>
    %c1 = arith.constant 1 : index
    %8 = memref.load %arg2[%c1] : memref<12xf32, #tpu.memory_space<smem>>
    %9 = vector.broadcast %8 : f32 to vector<16x1xf32>
    %10 = arith.mulf %2, %9 : vector<16x1xf32>
    %11 = arith.addf %7, %10 : vector<16x1xf32>
    %c2 = arith.constant 2 : index
    %12 = memref.load %arg2[%c2] : memref<12xf32, #tpu.memory_space<smem>>
    %13 = vector.broadcast %12 : f32 to vector<16x1xf32>
    %14 = arith.mulf %3, %13 : vector<16x1xf32>
    %15 = arith.addf %11, %14 : vector<16x1xf32>
    %c0_2 = arith.constant 0 : index
    %16 = memref.load %arg3[%c0_2] : memref<4xf32, #tpu.memory_space<smem>>
    %17 = vector.broadcast %16 : f32 to vector<16x1xf32>
    %18 = arith.addf %15, %17 : vector<16x1xf32>
    %cst_3 = arith.constant 0.000000e+00 : f32
    %19 = vector.broadcast %cst_3 : f32 to vector<16x1xf32>
    %20 = arith.maximumf %18, %19 : vector<16x1xf32>
    %c0_4 = arith.constant 0 : index
    %21 = memref.load %arg4[%c0_4] : memref<4xf32, #tpu.memory_space<smem>>
    %22 = vector.broadcast %21 : f32 to vector<16x1xf32>
    %23 = arith.mulf %20, %22 : vector<16x1xf32>
    %24 = arith.addf %4, %23 : vector<16x1xf32>
    %c3 = arith.constant 3 : index
    %25 = memref.load %arg2[%c3] : memref<12xf32, #tpu.memory_space<smem>>
    %26 = vector.broadcast %25 : f32 to vector<16x1xf32>
    %27 = arith.mulf %1, %26 : vector<16x1xf32>
    %c4 = arith.constant 4 : index
    %28 = memref.load %arg2[%c4] : memref<12xf32, #tpu.memory_space<smem>>
    %29 = vector.broadcast %28 : f32 to vector<16x1xf32>
    %30 = arith.mulf %2, %29 : vector<16x1xf32>
    %31 = arith.addf %27, %30 : vector<16x1xf32>
    %c5 = arith.constant 5 : index
    %32 = memref.load %arg2[%c5] : memref<12xf32, #tpu.memory_space<smem>>
    %33 = vector.broadcast %32 : f32 to vector<16x1xf32>
    %34 = arith.mulf %3, %33 : vector<16x1xf32>
    %35 = arith.addf %31, %34 : vector<16x1xf32>
    %c1_5 = arith.constant 1 : index
    %36 = memref.load %arg3[%c1_5] : memref<4xf32, #tpu.memory_space<smem>>
    %37 = vector.broadcast %36 : f32 to vector<16x1xf32>
    %38 = arith.addf %35, %37 : vector<16x1xf32>
    %cst_6 = arith.constant 0.000000e+00 : f32
    %39 = vector.broadcast %cst_6 : f32 to vector<16x1xf32>
    %40 = arith.maximumf %38, %39 : vector<16x1xf32>
    %c1_7 = arith.constant 1 : index
    %41 = memref.load %arg4[%c1_7] : memref<4xf32, #tpu.memory_space<smem>>
    %42 = vector.broadcast %41 : f32 to vector<16x1xf32>
    %43 = arith.mulf %40, %42 : vector<16x1xf32>
    %44 = arith.addf %24, %43 : vector<16x1xf32>
    %c6 = arith.constant 6 : index
    %45 = memref.load %arg2[%c6] : memref<12xf32, #tpu.memory_space<smem>>
    %46 = vector.broadcast %45 : f32 to vector<16x1xf32>
    %47 = arith.mulf %1, %46 : vector<16x1xf32>
    %c7 = arith.constant 7 : index
    %48 = memref.load %arg2[%c7] : memref<12xf32, #tpu.memory_space<smem>>
    %49 = vector.broadcast %48 : f32 to vector<16x1xf32>
    %50 = arith.mulf %2, %49 : vector<16x1xf32>
    %51 = arith.addf %47, %50 : vector<16x1xf32>
    %c8 = arith.constant 8 : index
    %52 = memref.load %arg2[%c8] : memref<12xf32, #tpu.memory_space<smem>>
    %53 = vector.broadcast %52 : f32 to vector<16x1xf32>
    %54 = arith.mulf %3, %53 : vector<16x1xf32>
    %55 = arith.addf %51, %54 : vector<16x1xf32>
    %c2_8 = arith.constant 2 : index
    %56 = memref.load %arg3[%c2_8] : memref<4xf32, #tpu.memory_space<smem>>
    %57 = vector.broadcast %56 : f32 to vector<16x1xf32>
    %58 = arith.addf %55, %57 : vector<16x1xf32>
    %cst_9 = arith.constant 0.000000e+00 : f32
    %59 = vector.broadcast %cst_9 : f32 to vector<16x1xf32>
    %60 = arith.maximumf %58, %59 : vector<16x1xf32>
    %c2_10 = arith.constant 2 : index
    %61 = memref.load %arg4[%c2_10] : memref<4xf32, #tpu.memory_space<smem>>
    %62 = vector.broadcast %61 : f32 to vector<16x1xf32>
    %63 = arith.mulf %60, %62 : vector<16x1xf32>
    %64 = arith.addf %44, %63 : vector<16x1xf32>
    %c9 = arith.constant 9 : index
    %65 = memref.load %arg2[%c9] : memref<12xf32, #tpu.memory_space<smem>>
    %66 = vector.broadcast %65 : f32 to vector<16x1xf32>
    %67 = arith.mulf %1, %66 : vector<16x1xf32>
    %c10 = arith.constant 10 : index
    %68 = memref.load %arg2[%c10] : memref<12xf32, #tpu.memory_space<smem>>
    %69 = vector.broadcast %68 : f32 to vector<16x1xf32>
    %70 = arith.mulf %2, %69 : vector<16x1xf32>
    %71 = arith.addf %67, %70 : vector<16x1xf32>
    %c11 = arith.constant 11 : index
    %72 = memref.load %arg2[%c11] : memref<12xf32, #tpu.memory_space<smem>>
    %73 = vector.broadcast %72 : f32 to vector<16x1xf32>
    %74 = arith.mulf %3, %73 : vector<16x1xf32>
    %75 = arith.addf %71, %74 : vector<16x1xf32>
    %c3_11 = arith.constant 3 : index
    %76 = memref.load %arg3[%c3_11] : memref<4xf32, #tpu.memory_space<smem>>
    %77 = vector.broadcast %76 : f32 to vector<16x1xf32>
    %78 = arith.addf %75, %77 : vector<16x1xf32>
    %cst_12 = arith.constant 0.000000e+00 : f32
    %79 = vector.broadcast %cst_12 : f32 to vector<16x1xf32>
    %80 = arith.maximumf %78, %79 : vector<16x1xf32>
    %c3_13 = arith.constant 3 : index
    %81 = memref.load %arg4[%c3_13] : memref<4xf32, #tpu.memory_space<smem>>
    %82 = vector.broadcast %81 : f32 to vector<16x1xf32>
    %83 = arith.mulf %80, %82 : vector<16x1xf32>
    %84 = arith.addf %64, %83 : vector<16x1xf32>
    %c0_14 = arith.constant 0 : index
    %85 = memref.load %arg5[%c0_14] : memref<1xf32, #tpu.memory_space<smem>>
    %86 = vector.broadcast %85 : f32 to vector<16x1xf32>
    %87 = arith.addf %84, %86 : vector<16x1xf32>
    %c0_15 = arith.constant 0 : index
    %c0_16 = arith.constant 0 : index
    %88 = vector.load %arg6[%c0_15, %c0_16] : memref<16x1xf32, #tpu.memory_space<vmem>>, vector<16x1xf32>
    tpu.vector_store %arg6[%c0_15, %c0_16], %87 {strides = array<i32>} : memref<16x1xf32, #tpu.memory_space<vmem>>, vector<16x1xf32>,
    return
  }
  func.func @transform_0(%arg0: i32) -> (i32, i32) {
    %c0_i32 = arith.constant 0 : i32
    %c0_i32_0 = arith.constant 0 : i32
    return %arg0, %c0_i32 : i32, i32
  }
  func.func @transform_1(%arg0: i32) -> i32 {
    %c0_i32 = arith.constant 0 : i32
    %c0_i32_0 = arith.constant 0 : i32
    return %c0_i32 : i32
  }
  func.func @transform_2(%arg0: i32) -> i32 {
    %c0_i32 = arith.constant 0 : i32
    %c0_i32_0 = arith.constant 0 : i32
    return %c0_i32 : i32
  }
  func.func @transform_3(%arg0: i32) -> i32 {
    %c0_i32 = arith.constant 0 : i32
    %c0_i32_0 = arith.constant 0 : i32
    return %c0_i32 : i32
  }
  func.func @transform_4(%arg0: i32) -> i32 {
    %c0_i32 = arith.constant 0 : i32
    %c0_i32_0 = arith.constant 0 : i32
    return %c0_i32 : i32
  }
  func.func @transform_5(%arg0: i32) -> (i32, i32) {
    %c0_i32 = arith.constant 0 : i32
    %c0_i32_0 = arith.constant 0 : i32
    return %arg0, %c0_i32 : i32, i32
  }
}

</mosaic_0001>

<bundles_post_ra>
// kernel: model_forward.1
= control target key start
LH: loop header
LB: loop body
LE: loop exit
PB: predicated region body
PF: predicated region fallthrough
CT: control target
= control target key end

     0   :  { %11 = vsyncpa [#allocation4], 0  ;;  %s432_s0 = inlined_call_operand.vmem [shape: f32[16,3], index: 0, kind: input, shape index: {}]   ;;  %s433_s1 = inlined_call_operand.vmem [shape: f32[12], index: 1, kind: input, shape index: {}]   ;;  %s434_s2 = inlined_call_operand.vmem [shape: f32[4], index: 2, kind: input, shape index: {}]   ;;  %s435_s3 = inlined_call_operand.vmem [shape: f32[4], index: 3, kind: input, shape index: {}]   ;;  %s436_s4 = inlined_call_operand.<no memory space> [shape: f32[1], index: 4, kind: input, shape index: {}]   ;;  %s437_s5 = inlined_call_operand.vmem [shape: f32[16,1], index: 5, kind: output, shape index: {}]  }
   0x1   :  { %12 = vsyncpa [#allocation6], 0  ;;  %s31_s20 = sshll.u32 %s434_s2, 4  ;;  %s21_s23 = sshll.u32 %s433_s1, 4  ;;  %s32_s20 = int_to_ptr.vmem [resolvable:$true] %s31_s20  ;;  %s22_s23 = int_to_ptr.vmem [resolvable:$true] %s21_s23 }
   0x2   :  { %s270_s24 = scalar_lea.vmem %s32_s20, 16  ;;  %p275_p1 = scmp.lt.s32.totalorder %s32_s20, %s32_s20 }
   0x3   :  { %p271_p0 = scmp.ne.s32.totalorder %s32_s20, %s270_s24  ;;  %p276_p2 = scmp.lt.s32.totalorder %s270_s24, %s270_s24 }
   0x5   :  { %p277_p3 = por %p276_p2, %p275_p1 }
   0x7   :  { %p278_p4 = pnand %p277_p3, %p271_p0 }
   0x9   :  { %281 = shalt.err (!%p278_p4)
}
   0xa   :  { %s310_s25 = smov [#allocation5]   ;;  %s282_s26 = scalar_lea.vmem %s22_s23, 16 }
   0xb   :  { %34 = dma.vmem_to_smem %s32_s20, 16, %s310_s25, [#allocation6]  }
   0xc   :  { %p283_p5 = scmp.ne.s32.totalorder %s22_s23, %s282_s26  ;;  %p287_p6 = scmp.lt.s32.totalorder %s22_s23, %s22_s23 }
   0xd   :  { %p288_p7 = scmp.lt.s32.totalorder %s282_s26, %s282_s26 }
   0xf   :  { %p289_p8 = por %p288_p7, %p287_p6 }
  0x11   :  { %p290_p9 = pnand %p289_p8, %p283_p5 }
  0x13   :  { %293 = shalt.err (!%p290_p9)
}
  0x14   :  { %s311_s2 = smov [#allocation3]   ;;  %s41_s28 = sshll.u32 %s435_s3, 4  ;;  %s42_s28 = int_to_ptr.vmem [resolvable:$true] %s41_s28 }
  0x15   :  { %24 = dma.vmem_to_smem %s22_s23, 16, %s311_s2, [#allocation4]  }
  0x16   :  { %s294_s29 = scalar_lea.vmem %s42_s28, 16  ;;  %p299_p11 = scmp.lt.s32.totalorder %s42_s28, %s42_s28 }
  0x17   :  { %p295_p10 = scmp.ne.s32.totalorder %s42_s28, %s294_s29  ;;  %p300_p12 = scmp.lt.s32.totalorder %s294_s29, %s294_s29 }
  0x19   :  { %p301_p13 = por %p300_p12, %p299_p11 }
  0x1b   :  { %p302_p0 = pnand %p301_p13, %p295_p10 }
  0x1d   :  { %305 = shalt.err (!%p302_p0)
}
  0x1e   :  { %s312_s30 = smov [#allocation7]  }
  0x1f   :  { %44 = dma.vmem_to_smem %s42_s28, 16, %s312_s30, [#allocation6]  }
  0x20   :  { %306 = dma.done.wait [#allocation4], 16  }
  0x21   :  { %307 = vsyncadd [#allocation4], 4294967280 }
  0x22   :  { %308 = dma.done.wait [#allocation6], 32  }
  0x23   :  { %309 = vsyncadd [#allocation6], 4294967264 }
  0x24   :  { %56 = sfence }
  0x25   :  { %s251_s6 = sld [smem:[#allocation3 + $0x4]]  ;;  %s248_s7 = sld [smem:[#allocation3 + $0x1]]  ;;  %v357_v0 = vld [vmem:[%s432_s0] sm:$0xff]  ;;  %v362_v1 = vld [vmem:[%s432_s0 + $0x8] sm:$0xff]  ;;  %vm239_vm0 = vcmask 7168  }
  0x26   :  { %s249_s8 = sld [smem:[#allocation3 + $0x2]]  ;;  %s252_s12 = sld [smem:[#allocation3 + $0x5]] }
  0x27   :  { %s313_s13 = smov 127   ;;  %s256_s14 = sld [smem:[#allocation3 + $0x7]] }
  0x28   :  { %s257_s0 = sld [smem:[#allocation3 + $0x8]]  ;;  %s314_s15 = smov 126  }
  0x29   :  { %s261_s16 = sld [smem:[#allocation3 + $0xa]]  ;;  %s262_s17 = sld [smem:[#allocation3 + $0xb]] }
  0x2a   :  { %s250_s18 = sld [smem:[#allocation3 + $0x3]]  ;;  %s59_s19 = sld [smem:[#allocation3]] }
  0x2b   :  { %v108_v2 = vstv %s251_s6  ;;  %v64_v4 = vstv %s248_s7  ;;  %s255_s20 = sld [smem:[#allocation3 + $0x6]]  ;;  %s388_s21 = sld [smem:[#allocation5 + $0x1]] }
  0x2c   :  { %v109_v3 = vmul.f32 %v108_v2, %v357_v0  ;;  %v65_v5 = vmul.f32 %v64_v4, %v357_v0  ;;  %v110_v6 = vmul.f32 %v108_v2, %v362_v1  ;;  %v66_v7 = vmul.f32 %v64_v4, %v362_v1  ;;  %s391_s22 = sld [smem:[#allocation5]]  ;;  %s394_s23 = sld [smem:[#allocation5 + $0x2]] }
  0x2d   :  { %v78_v8 = vstv %s249_s8  ;;  %v122_v11 = vstv %s252_s12  ;;  %v152_v14 = vstv %s256_s14  ;;  %s396_s24 = sld [smem:[#allocation3 + $0x9]]  ;;  %s402_s25 = sld [smem:[#allocation7]] }
  0x2e   :  { %113 = vrot.lane.b32.xlu1 %v109_v3, %s313_s13  ;;  %69 = vrot.lane.b32.xlu0 %v65_v5, %s313_s13  ;;  %v80_v9 = vmul.f32 %v78_v8, %v362_v1  ;;  %v79_v10 = vmul.f32 %v78_v8, %v357_v0  ;;  %v124_v12 = vmul.f32 %v122_v11, %v362_v1  ;;  %v166_v17 = vstv %s257_s0  ;;  %s405_s26 = sld [smem:[#allocation7 + $0x1]]  ;;  %s408_s2 = sld [smem:[#allocation7 + $0x2]] }
  0x2f   :  { %v123_v13 = vmul.f32 %v122_v11, %v357_v0  ;;  %v154_v15 = vmul.f32 %v152_v14, %v362_v1  ;;  %v153_v16 = vmul.f32 %v152_v14, %v357_v0  ;;  %v168_v18 = vmul.f32 %v166_v17, %v362_v1  ;;  %s412_s1 = sld [smem:[#allocation5 + $0x3]] }
  0x30   :  { %v167_v19 = vmul.f32 %v166_v17, %v357_v0  ;;  %v196_v20 = vstv %s261_s16  ;;  %v210_v23 = vstv %s262_s17  ;;  %v104_v31 = vstv %s250_s18  ;;  %s416_s27 = sld [smem:[#allocation7 + $0x3]] }
  0x31   :  { %v198_v21 = vmul.f32 %v196_v20, %v362_v1  ;;  %v197_v22 = vmul.f32 %v196_v20, %v357_v0  ;;  %v212_v24 = vmul.f32 %v210_v23, %v362_v1  ;;  %v211_v25 = vmul.f32 %v210_v23, %v357_v0 }
  0x32   :  { %115 = vrot.lane.b32.xlu1 %v110_v6, %s313_s13  ;;  %71 = vrot.lane.b32.xlu0 %v66_v7, %s313_s13  ;;  %v60_v33 = vstv %s59_s19  ;;  %v106_v34 = vmul.f32 %v104_v31, %v362_v1  ;;  %v105_v35 = vmul.f32 %v104_v31, %v357_v0  ;;  %v148_v37 = vstv %s255_s20 }
  0x33   :  { %v62_v38 = vmul.f32 %v60_v33, %v362_v1  ;;  %v61_v40 = vmul.f32 %v60_v33, %v357_v0  ;;  %v150_v42 = vmul.f32 %v148_v37, %v362_v1  ;;  %v149_v45 = vmul.f32 %v148_v37, %v357_v0 }
  0x34   :  { %v136_v50 = vstv %s388_s21  ;;  %v92_v52 = vstv %s391_s22  ;;  %v180_v57 = vstv %s394_s23  ;;  %v192_v59 = vstv %s396_s24 }
  0x35   :  { %v194_v5 = vmul.f32 %v192_v59, %v362_v1 }
  0x36   :  { %85 = vrot.lane.b32.xlu1 %v80_v9, %s314_s15  ;;  %83 = vrot.lane.b32.xlu0 %v79_v10, %s314_s15  ;;  %v193_v9 = vmul.f32 %v192_v59, %v357_v0 }
  0x3a   :  { %129 = vrot.lane.b32.xlu1 %v124_v12, %s314_s15  ;;  %127 = vrot.lane.b32.xlu0 %v123_v13, %s314_s15  ;;  %v98_v12 = vstv %s402_s25  ;;  %v142_v13 = vstv %s405_s26 }
  0x3e   :  { %159 = vrot.lane.b32.xlu1 %v154_v15, %s313_s13  ;;  %157 = vrot.lane.b32.xlu0 %v153_v16, %s313_s13  ;;  %v186_v16 = vstv %s408_s2 }
  0x42   :  { %173 = vrot.lane.b32.xlu1 %v168_v18, %s314_s15  ;;  %171 = vrot.lane.b32.xlu0 %v167_v19, %s314_s15 }
  0x46   :  { %203 = vrot.lane.b32.xlu1 %v198_v21, %s313_s13  ;;  %201 = vrot.lane.b32.xlu0 %v197_v22, %s313_s13  ;;  %v224_v21 = vstv %s412_s1 }
  0x4a   :  { %217 = vrot.lane.b32.xlu1 %v212_v24, %s314_s15  ;;  %215 = vrot.lane.b32.xlu0 %v211_v25, %s314_s15 }
  0xa0   :  { %v114_v26 = vpop.permute.xlu1 %113  ;;  %v70_v27 = vpop.permute.xlu0 %69 }
  0xa1   :  { %v119_v43 = vadd.f32 %v114_v26, %v105_v35  ;;  %v75_v49 = vadd.f32 %v70_v27, %v61_v40 }
  0xa4   :  { %v116_v28 = vpop.permute.xlu1 %115  ;;  %v72_v29 = vpop.permute.xlu0 %71 }
  0xa5   :  { %v120_v41 = vadd.f32 %v116_v28, %v106_v34  ;;  %v76_v46 = vadd.f32 %v72_v29, %v62_v38 }
  0xa8   :  { %v86_v30 = vpop.permute.xlu1 %85  ;;  %v84_v32 = vpop.permute.xlu0 %83 }
  0xa9   :  { %v90_v53 = vadd.f32 %v86_v30, %v76_v46  ;;  %v89_v55 = vadd.f32 %v84_v32, %v75_v49  ;;  %v230_v32 = vstv %s416_s27 }
  0xab   :  { %v94_v3 = vadd.f32 %v92_v52, %v90_v53  ;;  %v93_v6 = vadd.f32 %v92_v52, %v89_v55 }
  0xac   :  { %v130_v36 = vpop.permute.xlu1 %129  ;;  %v128_v39 = vpop.permute.xlu0 %127 }
  0xad   :  { %v134_v47 = vadd.f32 %v130_v36, %v120_v41  ;;  %v133_v51 = vadd.f32 %v128_v39, %v119_v43  ;;  %v96_v15 = vmax.f32 %v94_v3, 0.0  ;;  %v95_v19 = vmax.f32 %v93_v6, 0.0 }
  0xae   :  { %v236_v41 = vstv %s436_s4 }
  0xaf   :  { %v138_v60 = vadd.f32 %v136_v50, %v134_v47  ;;  %v137_v63 = vadd.f32 %v136_v50, %v133_v51  ;;  %v100_v27 = vmul.f32 %v98_v12, %v96_v15  ;;  %v99_v30 = vmul.f32 %v98_v12, %v95_v19 }
  0xb0   :  { %v160_v44 = vpop.permute.xlu1 %159  ;;  %v158_v48 = vpop.permute.xlu0 %157 }
  0xb1   :  { %v164_v54 = vadd.f32 %v160_v44, %v150_v42  ;;  %v163_v56 = vadd.f32 %v158_v48, %v149_v45  ;;  %v140_v10 = vmax.f32 %v138_v60, 0.0  ;;  %v139_v14 = vmax.f32 %v137_v63, 0.0 }
  0xb3   :  { %v144_v23 = vmul.f32 %v142_v13, %v140_v10  ;;  %v143_v25 = vmul.f32 %v142_v13, %v139_v14 }
  0xb4   :  { %v174_v58 = vpop.permute.xlu1 %173  ;;  %v172_v62 = vpop.permute.xlu0 %171 }
  0xb5   :  { %v178_v61 = vadd.f32 %v174_v58, %v164_v54  ;;  %v177_v2 = vadd.f32 %v172_v62, %v163_v56  ;;  %v146_v34 = vadd.f32 %v144_v23, %v100_v27  ;;  %v145_v36 = vadd.f32 %v143_v25, %v99_v30 }
  0xb7   :  { %v182_v4 = vadd.f32 %v180_v57, %v178_v61  ;;  %v181_v7 = vadd.f32 %v180_v57, %v177_v2 }
  0xb8   :  { %v204_v8 = vpop.permute.xlu1 %203  ;;  %v202_v11 = vpop.permute.xlu0 %201 }
  0xb9   :  { %v184_v17 = vmax.f32 %v182_v4, 0.0  ;;  %v208_v18 = vadd.f32 %v204_v8, %v194_v5  ;;  %v183_v1 = vmax.f32 %v181_v7, 0.0  ;;  %v207_v20 = vadd.f32 %v202_v11, %v193_v9 }
  0xbb   :  { %v188_v28 = vmul.f32 %v186_v16, %v184_v17  ;;  %v187_v31 = vmul.f32 %v186_v16, %v183_v1 }
  0xbc   :  { %v218_v22 = vpop.permute.xlu1 %217  ;;  %v216_v0 = vpop.permute.xlu0 %215 }
  0xbd   :  { %v222_v24 = vadd.f32 %v218_v22, %v208_v18  ;;  %v221_v26 = vadd.f32 %v216_v0, %v207_v20  ;;  %v190_v38 = vadd.f32 %v188_v28, %v146_v34  ;;  %v189_v40 = vadd.f32 %v187_v31, %v145_v36 }
  0xbf   :  { %v226_v29 = vadd.f32 %v224_v21, %v222_v24  ;;  %v225_v33 = vadd.f32 %v224_v21, %v221_v26 }
  0xc1   :  { %v228_v35 = vmax.f32 %v226_v29, 0.0  ;;  %v227_v37 = vmax.f32 %v225_v33, 0.0 }
  0xc3   :  { %v232_v39 = vmul.f32 %v230_v32, %v228_v35  ;;  %v231_v42 = vmul.f32 %v230_v32, %v227_v37 }
  0xc5   :  { %v234_v43 = vadd.f32 %v232_v39, %v190_v38  ;;  %v233_v44 = vadd.f32 %v231_v42, %v189_v40 }
  0xc7   :  { %v238_v45 = vadd.f32 %v236_v41, %v234_v43  ;;  %v237_v46 = vadd.f32 %v236_v41, %v233_v44 }
  0xc9   :  { %241 = vst.msk [vmem:[%s437_s5 + $0x8] sm:$0xff] %vm239_vm0, %v238_v45  ;;  %240 = vst.msk [vmem:[%s437_s5] sm:$0xff] %vm239_vm0, %v237_v46 }
  0xca   :  { %246 = vsyncpa [#allocation4], 1 }
  0xcb   :  { %247 = vsyncpa [#allocation6], 1 }

</bundles_post_ra>
